<compile_context>
chip_gen: v5e
topology: v5e:2x2
jax: 0.10.0
libtpu: 0.0.40
codegen_flags: <defaults>
</compile_context>

<pallas_src>
import math

import jax
import jax.numpy as jnp
from jax.experimental import pallas as pl
from jax.experimental.pallas import tpu as pltpu


def _quadratic_kernel(x_ref, a_ref, b_ref, c_ref, o_ref):
    x = x_ref[...]
    # Horner form: 2 mul + 2 add per element.  c_ref is (1, tn) and broadcasts
    # over the rows of the tile.
    z = x * (a_ref[...] * x + b_ref[...]) + c_ref[...]
    o_ref[...] = jax.nn.sigmoid(z).astype(o_ref.dtype)


def _round_up(v, m):
    return ((v + m - 1) // m) * m


def _call_tiled(x, a, b, c_row, *, tm, tn):
    """x, a, b: (R, W) f32; c_row: (1, W) f32, broadcast over rows."""
    R, W = x.shape

    # Column tile: full width if it fits, else a lane-aligned (x128) tile.
    # The wrapper guarantees W is a multiple of 128.
    if W <= tn:
        tn_eff = W
    else:
        tn_eff = max(128, (tn // 128) * 128)

    # Row tile: full height if it fits, else a sublane-aligned (x8) tile.
    if R <= tm:
        tm_eff = R
    else:
        tm_eff = max(8, (tm // 8) * 8)

    # Avoid a (1,1) grid when the problem is big enough to split: with a single
    # grid step, ("parallel","parallel") has nothing to shard across v7x's two
    # TensorCores.  Split rows into >= 2 blocks (no effect on v5e/v6e: 1 TC).
    if pl.cdiv(R, tm_eff) == 1 and pl.cdiv(W, tn_eff) == 1 and R >= 16:
        tm_eff = _round_up((R + 1) // 2, 8)

    grid = (pl.cdiv(R, tm_eff), pl.cdiv(W, tn_eff))
    xy_map = lambda i, j: (i, j)
    c_map = lambda i, j: (0, j)   # broadcast over rows, follow the lane tiles

    return pl.pallas_call(
        _quadratic_kernel,
        out_shape=jax.ShapeDtypeStruct((R, W), x.dtype),
        grid=grid,
        in_specs=[
            pl.BlockSpec((tm_eff, tn_eff), xy_map),
            pl.BlockSpec((tm_eff, tn_eff), xy_map),
            pl.BlockSpec((tm_eff, tn_eff), xy_map),
            pl.BlockSpec((1, tn_eff), c_map),
        ],
        out_specs=pl.BlockSpec((tm_eff, tn_eff), xy_map),
        compiler_params=pltpu.CompilerParams(
            dimension_semantics=("parallel", "parallel"),
            vmem_limit_bytes=48 * 1024 * 1024,
        ),
    )(x, a, b, c_row)


def quadratic_regression(x, a, b, c, *, tm=512, tn=2048):
    """x, a, b: (O, I) f32 ; c: (O,) f32 ; returns sigmoid(a*x^2 + b*x + c)."""
    O, I = a.shape
    assert x.shape == (O, I) and b.shape == (O, I) and c.shape == (O,)
    # PyTorch broadcasts the 1-D c over the trailing (in_features) axis, which
    # requires out_features == in_features.  Make that explicit.
    assert O == I, "PyTorch c-broadcast over the trailing axis requires O == I"

    if I % 128 == 0:
        # Lane-aligned path: c broadcasts over rows, tiled along I.
        return _call_tiled(x, a, b, c.reshape(1, I), tm=tm, tn=tn)

    n = O * I
    i_is_pow2 = (I & (I - 1)) == 0
    if i_is_pow2 and I < 128 and n % 128 == 0:
        # Lane-dense flatten: row-major reshape (O, I) -> (R, W) with W a
        # multiple of 128.  I (a power of two) divides W, so along every
        # flattened row the c value at column w is c[w % I]; the whole c row
        # is just jnp.tile(c, W // I) -> keep the cheap (1, W) broadcast path.
        W = 128
        while W * 2 <= 32768 and n % (W * 2) == 0 and n // (W * 2) >= 8:
            W *= 2
        R = n // W
        c_row = jnp.tile(c, W // I).reshape(1, W)
        out = _call_tiled(x.reshape(R, W), a.reshape(R, W), b.reshape(R, W),
                          c_row, tm=tm, tn=tn)
        return out.reshape(O, I)

    # Padding fallback: zero-pad the trailing dim to a lane multiple, run the
    # lane-aligned path, slice.  Padded columns compute sigmoid(0) and are
    # discarded; avoids masked vst.msk partial stores.
    I_pad = _round_up(I, 128)
    pad = I_pad - I
    xp = jnp.pad(x, ((0, 0), (0, pad)))
    ap = jnp.pad(a, ((0, 0), (0, pad)))
    bp = jnp.pad(b, ((0, 0), (0, pad)))
    cp = jnp.pad(c, (0, pad)).reshape(1, I_pad)
    out = _call_tiled(xp, ap, bp, cp, tm=tm, tn=tn)
    return out[:, :I]


def init_params(key, in_features, out_features):
    """Deterministic re-implementation of the module's reset_parameters()."""
    k_a, k_b, k_c = jax.random.split(key, 3)
    # kaiming_uniform_(w, a=sqrt(5)) -> bound = sqrt(6/((1+5)*fan_in)) = 1/sqrt(fan_in)
    fan_in = in_features
    bound_w = 1.0 / math.sqrt(fan_in)
    a = jax.random.uniform(k_a, (out_features, in_features), jnp.float32,
                           minval=-bound_w, maxval=bound_w)
    b = jax.random.uniform(k_b, (out_features, in_features), jnp.float32,
                           minval=-bound_w, maxval=bound_w)
    bound_c = 1.0 / math.sqrt(fan_in)
    c = jax.random.uniform(k_c, (out_features,), jnp.float32,
                           minval=-bound_c, maxval=bound_c)
    return a, b, c


def _reference(x, a, b, c):
    # Same broadcasting as PyTorch (c over the trailing axis).
    return jax.nn.sigmoid(a * x ** 2 + b * x + c)


if __name__ == "__main__":
    key = jax.random.PRNGKey(0)

    # --- lane-aligned path (I % 128 == 0); also exercises the 2-block
    # --- megacore row split (grid becomes (2, 1) instead of (1, 1)).
    O1 = I1 = 256
    k_x1, k_p1, key = jax.random.split(key, 3)
    a1, b1, c1 = init_params(k_p1, I1, O1)
    x1 = jax.random.normal(k_x1, (O1, I1), jnp.float32)
    out1 = jax.block_until_ready(quadratic_regression(x1, a1, b1, c1))
    ref1 = _reference(x1, a1, b1, c1)
    assert jnp.allclose(out1, ref1, atol=1e-5, rtol=1e-5), "lane-aligned path mismatch"

    # --- lane-dense flatten path (I = 32, power of two < 128) with tiled c row.
    O2 = I2 = 32
    k_x2, k_p2, key = jax.random.split(key, 3)
    a2, b2, c2 = init_params(k_p2, I2, O2)
    x2 = jax.random.normal(k_x2, (O2, I2), jnp.float32)
    out2 = jax.block_until_ready(quadratic_regression(x2, a2, b2, c2))
    ref2 = _reference(x2, a2, b2, c2)
    assert jnp.allclose(out2, ref2, atol=1e-5, rtol=1e-5), "lane-dense path mismatch"

    # --- padding fallback path (I = 100: not lane-aligned, not a power of two).
    O3 = I3 = 100
    k_x3, k_p3, key = jax.random.split(key, 3)
    a3, b3, c3 = init_params(k_p3, I3, O3)
    x3 = jax.random.normal(k_x3, (O3, I3), jnp.float32)
    out3 = jax.block_until_ready(quadratic_regression(x3, a3, b3, c3))
    ref3 = _reference(x3, a3, b3, c3)
    assert jnp.allclose(out3, ref3, atol=1e-5, rtol=1e-5), "padding path mismatch"

    print("KERNEL_OK")
</pallas_src>

<mosaic_0001>
module attributes {stable_mosaic.version = 11 : i64} {
  func.func @_quadratic_kernel(%arg0: i32, %arg1: i32, %arg2: memref<128x256xf32, #tpu.memory_space<vmem>>, %arg3: memref<128x256xf32, #tpu.memory_space<vmem>>, %arg4: memref<128x256xf32, #tpu.memory_space<vmem>>, %arg5: memref<1x256xf32, #tpu.memory_space<vmem>>, %arg6: memref<128x256xf32, #tpu.memory_space<vmem>>) attributes {dimension_semantics = [#tpu.dimension_semantics<parallel>, #tpu.dimension_semantics<parallel>], iteration_bounds = array<i64: 2, 1>, scalar_prefetch = 0 : i64, scratch_operands = 0 : i64, tpu.core_type = #tpu.core_type<tc>, window_params = [{transform_indices = @transform_0, window_bounds = array<i64: 128, 256>}, {transform_indices = @transform_1, window_bounds = array<i64: 128, 256>}, {transform_indices = @transform_2, window_bounds = array<i64: 128, 256>}, {transform_indices = @transform_3, window_bounds = array<i64: 1, 256>}, {transform_indices = @transform_4, window_bounds = array<i64: 128, 256>}]} {
    %c0 = arith.constant 0 : index
    %c0_0 = arith.constant 0 : index
    %0 = vector.load %arg2[%c0, %c0_0] : memref<128x256xf32, #tpu.memory_space<vmem>>, vector<128x256xf32>
    %c0_1 = arith.constant 0 : index
    %c0_2 = arith.constant 0 : index
    %1 = vector.load %arg3[%c0_1, %c0_2] : memref<128x256xf32, #tpu.memory_space<vmem>>, vector<128x256xf32>
    %2 = arith.mulf %1, %0 : vector<128x256xf32>
    %c0_3 = arith.constant 0 : index
    %c0_4 = arith.constant 0 : index
    %3 = vector.load %arg4[%c0_3, %c0_4] : memref<128x256xf32, #tpu.memory_space<vmem>>, vector<128x256xf32>
    %4 = arith.addf %2, %3 : vector<128x256xf32>
    %5 = arith.mulf %0, %4 : vector<128x256xf32>
    %c0_5 = arith.constant 0 : index
    %c0_6 = arith.constant 0 : index
    %6 = vector.load %arg5[%c0_5, %c0_6] : memref<1x256xf32, #tpu.memory_space<vmem>>, vector<1x256xf32>
    %7 = vector.broadcast %6 : vector<1x256xf32> to vector<128x256xf32>
    %8 = arith.addf %5, %7 : vector<128x256xf32>
    %9 = arith.negf %8 : vector<128x256xf32>
    %10 = math.exp %9 : vector<128x256xf32>
    %cst = arith.constant 1.000000e+00 : f32
    %11 = vector.broadcast %cst : f32 to vector<128x256xf32>
    %12 = arith.addf %11, %10 : vector<128x256xf32>
    %13 = arith.divf %11, %12 : vector<128x256xf32>
    %c0_7 = arith.constant 0 : index
    %c0_8 = arith.constant 0 : index
    %14 = vector.load %arg6[%c0_7, %c0_8] : memref<128x256xf32, #tpu.memory_space<vmem>>, vector<128x256xf32>
    tpu.vector_store %arg6[%c0_7, %c0_8], %13 {strides = array<i32>} : memref<128x256xf32, #tpu.memory_space<vmem>>, vector<128x256xf32>,
    return
  }
  func.func @transform_0(%arg0: i32, %arg1: i32) -> (i32, i32) {
    %c0_i32 = arith.constant 0 : i32
    return %arg0, %arg1 : i32, i32
  }
  func.func @transform_1(%arg0: i32, %arg1: i32) -> (i32, i32) {
    %c0_i32 = arith.constant 0 : i32
    return %arg0, %arg1 : i32, i32
  }
  func.func @transform_2(%arg0: i32, %arg1: i32) -> (i32, i32) {
    %c0_i32 = arith.constant 0 : i32
    return %arg0, %arg1 : i32, i32
  }
  func.func @transform_3(%arg0: i32, %arg1: i32) -> (i32, i32) {
    %c0_i32 = arith.constant 0 : i32
    %c0_i32_0 = arith.constant 0 : i32
    return %c0_i32, %arg1 : i32, i32
  }
  func.func @transform_4(%arg0: i32, %arg1: i32) -> (i32, i32) {
    %c0_i32 = arith.constant 0 : i32
    return %arg0, %arg1 : i32, i32
  }
}

</mosaic_0001>

<bundles_post_ra>
// kernel: tpu_custom_call.1
= control target key start
LH: loop header
LB: loop body
LE: loop exit
PB: predicated region body
PF: predicated region fallthrough
CT: control target
= control target key end

     0   :  { %s2903_s0 = inlined_call_operand.hbm [shape: f32[256,256], index: 0, kind: input, shape index: {}]   ;;  %s2904_s1 = inlined_call_operand.hbm [shape: f32[256,256], index: 1, kind: input, shape index: {}]   ;;  %s2905_s2 = inlined_call_operand.hbm [shape: f32[256,256], index: 2, kind: input, shape index: {}]   ;;  %s2906_s3 = inlined_call_operand.vmem [shape: f32[1,256], index: 3, kind: input, shape index: {}]   ;;  %s2907_s4 = inlined_call_operand.hbm [shape: f32[256,256], index: 4, kind: output, shape index: {}]  }
   0x1   :  { %2914 = sst [smem:[#allocation18_spill]] %s2904_s1 }
   0x2   :  { %9 = vsyncpa [#allocation3], 0 }
   0x3   :  { %11 = vsyncpa [#allocation3 + $0x1], 0 }
   0x4   :  { %12 = vsyncpa [#allocation6], 0 }
   0x5   :  { %14 = vsyncpa [#allocation6 + $0x1], 0 }
   0x6   :  { %15 = vsyncpa [#allocation4], 0 }
   0x7   :  { %17 = vsyncpa [#allocation4 + $0x1], 0  ;;  %s1871_s15 = smov 0   ;;  %s1873_s16 = smov 0  }
   0x8   :  { %s1875_s17 = smov 0   ;;  %s1877_s18 = smov 0  }
   0x9   :  { %s1879_s19 = smov 0   ;;  %s1881_s20 = smov 0  }
   0xa LB: > { %2915 = sst [smem:[#allocation12_spill]] %s1828_s17  ;;  %s1902_s21 = sadd.s32 4294967295, %s1840_s20   ;;  %s1840_s20 = sphi %s1881_s20, %s23_s20   ;;  %s1836_s19 = sphi %s1879_s19, %s3048_s19   ;;  %s1832_s18 = sphi %s1877_s18, %s3047_s18   ;;  %s1828_s17 = sphi %s1875_s17, %s3046_s17   ;;  %s1824_s16 = sphi %s1873_s16, %s3050_s16   ;;  %s1820_s15 = sphi %s1871_s15, %s3049_s15  }
   0xb   : > { %2916 = sst [smem:[#allocation13_spill]] %s1836_s19  ;;  %s1393_s22 = sadd.s32 4294967294, %s1840_s20  }
   0xc   : > { %2917 = sst [smem:[#allocation14_spill]] %s1840_s20  ;;  %s35_s23 = sadd.s32 1, %s1836_s19 }
   0xd   : > { %s44_s24 = sadd.s32 1, %s1828_s17  ;;  %p37_p0 = scmp.ge.s32.totalorder %s35_s23, 2 }
   0xe   : > { %p51_p1 = scmp.ne.s32.totalorder %s1828_s17, %s1824_s16  ;;  %p52_p2 = scmp.eq.s32.totalorder %s1840_s20, 0 }
   0xf   : > { %p57_p3 = scmp.ne.s32.totalorder %s1824_s16, %s1820_s15  ;;  %s3052_s23 = smov (%p37_p0, %s35_s23), 0 }
  0x10   : > { %2918 = sst [smem:[#allocation15_spill]] %s3052_s23  ;;  %p1914_p4 = por %p52_p2, %p51_p1 }
  0x11   : > { %p58_p5 = scmp.eq.s32.totalorder %s1902_s21, 0  ;;  %s39_s26 = ssub.s32 %s1836_s19, %s3052_s23 }
  0x12   : > { %p165_p6 = scmp.eq.s32.totalorder %s1902_s21, 1  ;;  %p42_p7 = scmp.eq.s32.totalorder %s39_s26, 0 }
  0x13   : > { %p1922_p8 = por %p58_p5, %p57_p3  ;;  %p171_p10 = scmp.eq.s32.totalorder %s1393_s22, 1 }
  0x14   : > { %p1926_p9 = por %p165_p6, %p51_p1  ;;  %p1396_p12 = scmp.ge.s32.totalorder %s1840_s20, 2 }
  0x15   : > { %s1931_s29 = scalar_select %p42_p7, %s1828_s17, %s44_s24  }
  0x16   : > { %p1933_p11 = por %p171_p10, %p57_p3  ;;  %p1482_p13 = scmp.lt.s32.totalorder %s1840_s20, 2 }
  0x17   : > { %2922 = sst [smem:[#allocation16_spill]] %s1931_s29  ;;  %s199_s5 = sand.u32 1, %s1828_s17  }
  0x18   : > { %s2923_s30 = scalar_select %p1933_p11, 1, 0 }
  0x19   : > { %s1940_s6 = sshll.u32 %s199_s5, 8  ;;  %s1453_s7 = sshll.u32 %s1836_s19, 8 }
  0x1a   : > { %2924 = sst [smem:[#allocation17_spill]] %s2923_s30  ;;  %p1945_p0 = pnand %p1482_p13, %p1914_p4 }
  0x1b   : > { %s224_s9 = sand.u32 1, %s1840_s20   ;;  %s2926_s1 = sld [smem:[#allocation18_spill]] }
  0x1c   : > { %s228_s14 = scalar_lea.vmem [#allocation5], %s1940_s6  ;;  %s225_s24 = scalar_lea.sflag [#allocation6], %s224_s9 }
  0x1d   : > { %s239_s22 = sshll.u32 %s228_s14, 4  ;;  %s1842_s26 = smov 256   ;;  %s240_s22 = int_to_ptr.vmem [resolvable:$true] %s239_s22 }
  0x1e   : > { %s1843_s25 = smov 16   ;;  %p1409_p1 = scmp.ge.s32.totalorder %s1840_s20, 1 }
  0x1f   : > { %p272_p2 = scmp.lt.s32.totalorder %s1840_s20, 3  ;;  %s200_s9 = scalar_lea.sflag [#allocation3], %s199_s5 }
  0x20   : > { %s261_s29 = scalar_lea.hbm %s2905_s2, %s1453_s7  ;;  %s253_s20 = scalar_lea.vmem [#allocation7], %s1940_s6 }
  0x21   : > { %s236_s12 = scalar_lea.hbm %s2926_s1, %s1453_s7  ;;  %p1958_p3 = pnand %p1409_p1, %p272_p2 }
  0x22   : > { %s237_s13 = sshll.u32 %s236_s12, 4  ;;  %s211_s12 = scalar_lea.hbm %s2903_s0, %s1453_s7  ;;  %s238_s13 = int_to_ptr.hbm [resolvable:$true] %s237_s13 }
  0x23   : > { %1474 = dma.hbm_to_vmem [thread:$0]  (!%p1945_p0), %s238_s13, 4096, %s240_s22, %s225_s24, %s1842_s26, %s1842_s26, %s1843_s25  }
  0x24   : > { %s212_s14 = sshll.u32 %s211_s12, 4  ;;  %s203_s1 = scalar_lea.vmem [#allocation2], %s1940_s6  ;;  %s213_s14 = int_to_ptr.hbm [resolvable:$true] %s212_s14 }
  0x25   : > { %s214_s19 = sshll.u32 %s203_s1, 4  ;;  %s262_s17 = sshll.u32 %s261_s29, 4  ;;  %s215_s19 = int_to_ptr.vmem [resolvable:$true] %s214_s19  ;;  %s263_s17 = int_to_ptr.hbm [resolvable:$true] %s262_s17 }
  0x26   : > { %1471 = dma.hbm_to_vmem [thread:$0]  (!%p1945_p0), %s213_s14, 4096, %s215_s19, %s200_s9, %s1842_s26, %s1842_s26, %s1843_s25  }
  0x27   : > { %s264_s30 = sshll.u32 %s253_s20, 4  ;;  %276 = sbr.rel (%p1958_p3) target bundleno = 234 (0xea), region = 36  ;;  %s265_s30 = int_to_ptr.vmem [resolvable:$true] %s264_s30 }
  0x28   : > { %1477 = dma.hbm_to_vmem [thread:$0]  (!%p1945_p0), %s263_s17, 4096, %s265_s30, %s225_s24, %s1842_s26, %s1842_s26, %s1843_s25  }
  0x29   : > { %s1977_s1 = sand.u32 (!%p1958_p3), 1, %s1824_s16  }
  0x2a   : > { %s1980_s19 = sshll.u32 (!%p1958_p3), %s1977_s1, 8  ;;  %s279_s5 = scalar_lea.sflag (!%p1958_p3), [#allocation3], %s1977_s1 }
  0x2b   : > { %s1984_s29 = scalar_lea.vmem (!%p1958_p3), [#allocation2], %s1980_s19 }
  0x2c   : > { %1807 = dma.done.wait (%p1922_p8), %s279_s5, 4096  }
  0x2d   : > { %1809 = vsyncadd (%p1922_p8), %s279_s5, 4294963200  ;;  %s288_s17 = sand.u32 1, %s1902_s21   ;;  %s1992_s23 = scalar_lea.vmem [#allocation5], %s1980_s19 }
  0x2e   : > { %s289_s20 = scalar_lea.sflag [#allocation6], %s288_s17 }
  0x2f   : > { %1811 = dma.done.wait (%p1922_p8), %s289_s20, 8192  }
  0x30   : > { %1813 = vsyncadd (%p1922_p8), %s289_s20, 4294959104  ;;  %v355_v0 = vld [vmem:[%s1984_s29] sm:$0xff]  ;;  %s2001_s21 = scalar_lea.vmem [#allocation7], %s1980_s19  ;;  %v356_v5 = vld [vmem:[%s1984_s29 + $0x8] sm:$0xff]  ;;  %s2168_s6 = scalar_lea.vmem [#allocation8], %s1980_s19 }
  0x31   : > { %v387_v1 = vld [vmem:[%s1992_s23] sm:$0xff]  ;;  %v388_v6 = vld [vmem:[%s1992_s23 + $0x8] sm:$0xff]  ;;  %v357_v9 = vld [vmem:[%s1984_s29 + $0x10] sm:$0xff]  ;;  %s1459_s7 = sshll.u32 %s1832_s18, 8  ;;  %s1241_s25 = sshll.u32 %s2168_s6, 4  ;;  %s1242_s25 = int_to_ptr.vmem [resolvable:$true] %s1241_s25 }
  0x32   : > { %v451_v2 = vld [vmem:[%s2001_s21] sm:$0xff]  ;;  %v419_v3 = vmul.f32 %v387_v1, %v355_v0  ;;  %v420_v7 = vmul.f32 %v388_v6, %v356_v5  ;;  %v452_v8 = vld [vmem:[%s2001_s21 + $0x8] sm:$0xff]  ;;  %v389_v10 = vld [vmem:[%s1992_s23 + $0x10] sm:$0xff]  ;;  %s1240_s26 = scalar_lea.hbm %s2907_s4, %s1459_s7  ;;  %s1226_s18 = scalar_lea.sflag [#allocation4], %s1977_s1 }
  0x33   : > { %v547_v4 = vld [vmem:[%s2906_s3] sm:$0x3]  ;;  %v421_v13 = vmul.f32 %v389_v10, %v357_v9  ;;  %v453_v14 = vld [vmem:[%s2001_s21 + $0x10] sm:$0xff]  ;;  %v358_v15 = vld [vmem:[%s1984_s29 + $0x18] sm:$0xff]  ;;  %s1243_s10 = sshll.u32 %s1240_s26, 4  ;;  %s1774_s13 = scalar_lea.hbm %s2907_s4, 512  ;;  %s1244_s10 = int_to_ptr.hbm [resolvable:$true] %s1243_s10 }
  0x34   : > { %v483_v11 = vadd.f32 %v451_v2, %v419_v3  ;;  %v2012_v12 = vperm.slane %v547_v4, 0  ;;  %v390_v16 = vld [vmem:[%s1992_s23 + $0x18] sm:$0xff]  ;;  %v484_v17 = vadd.f32 %v452_v8, %v420_v7  ;;  %v2017_v18 = vperm.slane %v547_v4, 1  ;;  %v359_v21 = vld [vmem:[%s1984_s29 + $0x20] sm:$0xff]  ;;  %v360_v27 = vld [vmem:[%s1984_s29 + $0x28] sm:$0xff]  ;;  %s1768_s11 = sshra.s32 %s1244_s10, 4  ;;  %s1769_s11 = int_to_ptr.hbm [resolvable:$true] %s1768_s11 }
  0x35   : > { %v422_v19 = vmul.f32 %v390_v16, %v358_v15  ;;  %v454_v20 = vld [vmem:[%s2001_s21 + $0x18] sm:$0xff]  ;;  %v391_v22 = vld [vmem:[%s1992_s23 + $0x20] sm:$0xff]  ;;  %v485_v24 = vadd.f32 %v453_v14, %v421_v13  ;;  %v392_v28 = vld [vmem:[%s1992_s23 + $0x28] sm:$0xff]  ;;  %s1770_s12 = scalar_lea.hbm %s1769_s11, 256  ;;  %p1775_p7 = scmp.lt.s32.totalorder %s1769_s11, %s2907_s4 }
  0x36   : > { %v515_v23 = vmul.f32 %v483_v11, %v355_v0  ;;  %v423_v25 = vmul.f32 %v391_v22, %v359_v21  ;;  %v455_v26 = vld [vmem:[%s2001_s21 + $0x20] sm:$0xff]  ;;  %v516_v29 = vmul.f32 %v484_v17, %v356_v5  ;;  %v424_v31 = vmul.f32 %v392_v28, %v360_v27  ;;  %v456_v32 = vld [vmem:[%s2001_s21 + $0x28] sm:$0xff]  ;;  %v361_v33 = vld [vmem:[%s1984_s29 + $0x30] sm:$0xff]  ;;  %p1771_p4 = scmp.ne.s32.totalorder %s1769_s11, %s1770_s12  ;;  %p1776_p8 = scmp.lt.s32.totalorder %s1774_s13, %s1770_s12 }
  0x37   : > { %v486_v30 = vadd.f32 %v454_v20, %v422_v19  ;;  %v393_v34 = vld [vmem:[%s1992_s23 + $0x30] sm:$0xff]  ;;  %v517_v36 = vmul.f32 %v485_v24, %v357_v9  ;;  %v362_v40 = vld [vmem:[%s1984_s29 + $0x38] sm:$0xff]  ;;  %v363_v55 = vld [vmem:[%s1984_s29 + $0x40] sm:$0xff] }
  0x38   : > { %v553_v35 = vadd.f32 %v2012_v12, %v515_v23  ;;  %v487_v37 = vadd.f32 %v455_v26, %v423_v25  ;;  %v425_v38 = vmul.f32 %v393_v34, %v361_v33  ;;  %v457_v39 = vld [vmem:[%s2001_s21 + $0x30] sm:$0xff]  ;;  %v394_v41 = vld [vmem:[%s1992_s23 + $0x38] sm:$0xff]  ;;  %v554_v42 = vadd.f32 %v2017_v18, %v516_v29  ;;  %v395_v56 = vld [vmem:[%s1992_s23 + $0x40] sm:$0xff]  ;;  %p1772_p5 = pnand %p1771_p4, %p1926_p9  ;;  %p1777_p10 = por %p1776_p8, %p1775_p7 }
  0x39   : > { %v518_v43 = vmul.f32 %v486_v30, %v358_v15  ;;  %v488_v44 = vadd.f32 %v456_v32, %v424_v31  ;;  %v426_v45 = vmul.f32 %v394_v41, %v362_v40  ;;  %v458_v46 = vld [vmem:[%s2001_s21 + $0x38] sm:$0xff]  ;;  %v555_v48 = vadd.f32 %v2012_v12, %v517_v36  ;;  %v364_v60 = vld [vmem:[%s1984_s29 + $0x48] sm:$0xff]  ;;  %v459_v1 = vld [vmem:[%s2001_s21 + $0x40] sm:$0xff] }
  0x3a   : > { %v1414_v47 = vmul.f32 -1.442695, %v553_v35  ;;  %v519_v49 = vmul.f32 %v487_v37, %v359_v21  ;;  %v489_v50 = vadd.f32 %v457_v39, %v425_v38  ;;  %v1415_v51 = vmul.f32 -1.442695, %v554_v42  ;;  %v396_v61 = vld [vmem:[%s1992_s23 + $0x48] sm:$0xff]  ;;  %v365_v2 = vld [vmem:[%s1984_s29 + $0x50] sm:$0xff]  ;;  %p1773_p6 = pneg %p1772_p5 }
  0x3b   : > { %v556_v52 = vadd.f32 %v2017_v18, %v518_v43  ;;  %v520_v53 = vmul.f32 %v488_v44, %v360_v27  ;;  %v490_v54 = vadd.f32 %v458_v46, %v426_v45  ;;  %v1416_v57 = vmul.f32 -1.442695, %v555_v48  ;;  %v397_v3 = vld [vmem:[%s1992_s23 + $0x50] sm:$0xff]  ;;  %v460_v7 = vld [vmem:[%s2001_s21 + $0x48] sm:$0xff]  ;;  %v2049_v11 = vld [vmem:[%s1984_s29 + $0x58] sm:$0xff] }
  0x3c   : > { %1536 = vpow2.f32 %v1414_v47  ;;  %v557_v58 = vadd.f32 %v2012_v12, %v519_v49  ;;  %v521_v59 = vmul.f32 %v489_v50, %v361_v33  ;;  %v427_v6 = vmul.f32 %v395_v56, %v363_v55  ;;  %v398_v13 = vld [vmem:[%s1992_s23 + $0x58] sm:$0xff]  ;;  %v461_v20 = vld [vmem:[%s2001_s21 + $0x50] sm:$0xff]  ;;  %v2054_v21 = vld [vmem:[%s1984_s29 + $0x60] sm:$0xff]  ;;  %p1778_p13 = pnand %p1777_p10, %p1773_p6 }
  0x3d   : > { %1538 = vpow2.f32 %v1415_v51  ;;  %v1417_v62 = vmul.f32 -1.442695, %v556_v52  ;;  %v558_v63 = vadd.f32 %v2017_v18, %v520_v53  ;;  %v522_v0 = vmul.f32 %v490_v54, %v362_v40  ;;  %v399_v22 = vld [vmem:[%s1992_s23 + $0x60] sm:$0xff]  ;;  %v462_v28 = vld [vmem:[%s2001_s21 + $0x58] sm:$0xff] }
  0x3e   : > { %1540 = vpow2.f32 %v1416_v57  ;;  %v1418_v4 = vmul.f32 -1.442695, %v557_v58  ;;  %v559_v5 = vadd.f32 %v2012_v12, %v521_v59  ;;  %v428_v10 = vmul.f32 %v396_v61, %v364_v60  ;;  %v463_v36 = vld [vmem:[%s2001_s21 + $0x60] sm:$0xff] }
  0x3f   : > { %1542 = vpow2.f32 %v1417_v62  ;;  %v1419_v8 = vmul.f32 -1.442695, %v558_v63  ;;  %v560_v9 = vadd.f32 %v2017_v18, %v522_v0  ;;  %v491_v15 = vadd.f32 %v459_v1, %v427_v6 }
  0x40   : > { %1544 = vpow2.f32 %v1418_v4  ;;  %v1420_v14 = vmul.f32 -1.442695, %v559_v5  ;;  %v429_v16 = vmul.f32 %v397_v3, %v365_v2  ;;  %v492_v19 = vadd.f32 %v460_v7, %v428_v10 }
  0x41   : > { %1546 = vpow2.f32 %v1419_v8  ;;  %v1421_v17 = vmul.f32 -1.442695, %v560_v9  ;;  %v523_v24 = vmul.f32 %v491_v15, %v363_v55  ;;  %v430_v25 = vmul.f32 %v398_v13, %v2049_v11  ;;  %v400_v15 = vld [vmem:[%s1992_s23 + $0x68] sm:$0xff] }
  0x42   : > { %v1537_v23 = vpop.eup %1536  ;;  %1548 = vpow2.f32 %v1420_v14  ;;  %v493_v31 = vadd.f32 %v461_v20, %v429_v16  ;;  %v431_v32 = vmul.f32 %v399_v22, %v2054_v21  ;;  %v2066_v35 = vmul.f32 %v492_v19, %v364_v60  ;;  %v401_v19 = vld [vmem:[%s1992_s23 + $0x70] sm:$0xff] }
  0x43   : > { %v1539_v26 = vpop.eup %1538  ;;  %v2058_v27 = vadd.f32 1.0, %v1537_v23  ;;  %1550 = vpow2.f32 %v1421_v17  ;;  %v2072_v39 = vadd.f32 %v2012_v12, %v523_v24  ;;  %v2074_v40 = vadd.f32 %v462_v28, %v430_v25 }
  0x44   : > { %v1541_v29 = vpop.eup %1540  ;;  %v2061_v30 = vadd.f32 1.0, %v1539_v26  ;;  %v2085_v47 = vmul.f32 %v493_v31, %v365_v2  ;;  %v2087_v48 = vadd.f32 %v463_v36, %v431_v32 }
  0x45   : > { %v1543_v33 = vpop.eup %1542  ;;  %1552 = vrcp.f32 %v2058_v27  ;;  %v724_v34 = vand.u32 2147483648, %v2058_v27  ;;  %v722_v38 = vand.u32 2147483647, %v2058_v27  ;;  %v2078_v44 = vadd.f32 1.0, %v1541_v29 }
  0x46   : > { %v1545_v37 = vpop.eup %1544  ;;  %1554 = vrcp.f32 %v2061_v30  ;;  %v737_v42 = vand.u32 2147483647, %v2061_v30  ;;  %v739_v43 = vand.u32 2147483648, %v2061_v30  ;;  %v2080_v45 = vadd.f32 1.0, %v1543_v33 }
  0x47   : > { %v1547_v41 = vpop.eup %1546  ;;  %vm718_vm0 = vweird.f32 %v2058_v27  ;;  %v2083_v46 = vadd.f32 1.0, %v1545_v37  ;;  %v725_v50 = vor.u32 1.1754944e-38, %v724_v34  ;;  %vm733_vm1 = vweird.f32 %v2061_v30 }
  0x48   : > { %v1549_v49 = vpop.eup %1548  ;;  %1556 = vrcp.f32 %v2078_v44  ;;  %v754_v51 = vand.u32 2147483648, %v2078_v44  ;;  %vm2092_vm2 = vcmp.eq.f32.partialorder %v722_v38, 8.507059e+37  ;;  %v752_v54 = vand.u32 2147483647, %v2078_v44 }
  0x49   : > { %v1551_v52 = vpop.eup %1550  ;;  %1558 = vrcp.f32 %v2080_v45  ;;  %v769_v55 = vand.u32 2147483648, %v2080_v45  ;;  %v2099_v56 = vadd.f32 1.0, %v1547_v41  ;;  %vm2101_vm3 = vcmp.eq.f32.partialorder %v737_v42, 8.507059e+37 }
  0x4a   : > { %v740_v59 = vor.u32 1.1754944e-38, %v739_v43  ;;  %v767_v60 = vand.u32 2147483647, %v2080_v45  ;;  %1560 = vrcp.f32 %v2083_v46  ;;  %vm748_vm4 = vweird.f32 %v2078_v44 }
  0x4b   : > { %v1553_v57 = vpop.eup %1552  ;;  %v2109_v63 = vor.u32 1.1754944e-38, %v754_v51  ;;  %vm763_vm5 = vweird.f32 %v2080_v45  ;;  %vm778_vm6 = vweird.f32 %v2083_v46  ;;  %v782_v1 = vand.u32 2147483647, %v2083_v46 }
  0x4c   : > { %v1555_v61 = vpop.eup %1554  ;;  %v714_v62 = vmul.f32 %v1553_v57, %v2058_v27  ;;  %v784_v2 = vand.u32 2147483648, %v2083_v46  ;;  %vm719_vm7 = vweird.f32 %v1553_v57  ;;  %vm2116_vm8 = vcmp.eq.f32.partialorder %v752_v54, 8.507059e+37 }
  0x4d   : > { %v729_v0 = vmul.f32 %v1555_v61, %v2061_v30  ;;  %v770_v5 = vor.u32 1.1754944e-38, %v769_v55  ;;  %1562 = vrcp.f32 %v2099_v56  ;;  %vm734_vm9 = vweird.f32 %v1555_v61  ;;  %vm2135_vm13 = vmor %vm718_vm0, %vm719_vm7 }
  0x4e   : > { %v715_v3 = vsub.f32 1.0, %v714_v62  ;;  %v1557_v6 = vpop.eup %1556  ;;  %vm2121_vm10 = vcmp.eq.f32.partialorder %v767_v60, 8.507059e+37  ;;  %v797_v9 = vand.u32 2147483647, %v2099_v56  ;;  %vm2128_vm12 = vcmp.eq.f32.partialorder %v782_v1, 8.507059e+37  ;;  %vm2144_vm15 = vmor %vm733_vm1, %vm734_vm9 }
  0x4f   : > { %v730_v7 = vsub.f32 1.0, %v729_v0  ;;  %v1559_v10 = vpop.eup %1558  ;;  %v744_v14 = vmul.f32 %v1557_v6, %v2078_v44  ;;  %v785_v16 = vor.u32 1.1754944e-38, %v784_v2  ;;  %vm749_vm14 = vweird.f32 %v1557_v6 }
  0x50   : > { %v716_v13 = vmul.f32 %v1553_v57, %v715_v3  ;;  %v1561_v17 = vpop.eup %1560  ;;  %v759_v22 = vmul.f32 %v1559_v10, %v2080_v45  ;;  %v799_v23 = vand.u32 2147483648, %v2099_v56  ;;  %vm764_vm11 = vweird.f32 %v1559_v10  ;;  %vm2162_vm1 = vmor %vm748_vm4, %vm749_vm14 }
  0x51   : > { %v731_v20 = vmul.f32 %v1555_v61, %v730_v7  ;;  %v745_v26 = vsub.f32 1.0, %v744_v14  ;;  %v774_v27 = vmul.f32 %v1561_v17, %v2083_v46  ;;  %vm779_vm0 = vweird.f32 %v1561_v17  ;;  %v368_v14 = vld [vmem:[%s1984_s29 + $0x68] sm:$0xff] }
  0x52   : > { %v717_v24 = vadd.f32 %v1553_v57, %v716_v13  ;;  %v760_v29 = vsub.f32 1.0, %v759_v22  ;;  %v2149_v31 = vadd.f32 1.0, %v1549_v49  ;;  %v2153_v36 = vadd.f32 1.0, %v1551_v52  ;;  %vm2185_vm4 = vmor %vm778_vm6, %vm779_vm0  ;;  %v464_v22 = vld [vmem:[%s2001_s21 + $0x68] sm:$0xff] }
  0x53   : > { %v732_v28 = vadd.f32 %v1555_v61, %v731_v20  ;;  %v1563_v32 = vpop.eup %1562  ;;  %v746_v34 = vmul.f32 %v1557_v6, %v745_v26  ;;  %v775_v30 = vsub.f32 1.0, %v774_v27  ;;  %v1422_v52 = vmul.f32 -1.442695, %v2072_v39  ;;  %v465_v26 = vld [vmem:[%s2001_s21 + $0x70] sm:$0xff]  ;;  %v370_v27 = vld [vmem:[%s1984_s29 + $0x78] sm:$0xff] }
  0x54   : > { %v721_v33 = vsel %vm2135_vm13, %v1553_v57, %v717_v24  ;;  %v761_v42 = vmul.f32 %v1559_v10, %v760_v29  ;;  %v789_v43 = vmul.f32 %v1563_v32, %v2099_v56  ;;  %1564 = vrcp.f32 %v2149_v31 }
  0x55   : > { %v726_v37 = vsel %vm2092_vm2, %v725_v50, %v721_v33  ;;  %v736_v38 = vsel %vm2144_vm15, %v1555_v61, %v732_v28  ;;  %v747_v50 = vadd.f32 %v1557_v6, %v746_v34  ;;  %vm2176_vm2 = vmor %vm763_vm5, %vm764_vm11  ;;  %v776_v51 = vmul.f32 %v1561_v17, %v775_v30  ;;  %v402_v28 = vld [vmem:[%s1992_s23 + $0x78] sm:$0xff] }
  0x56   : > { %1193 = vst [vmem:[%s2168_s6] sm:$0xff] %v726_v37  ;;  %v741_v49 = vsel %vm2101_vm3, %v740_v59, %v736_v38  ;;  %v762_v53 = vadd.f32 %v1559_v10, %v761_v42  ;;  %v790_v55 = vsub.f32 1.0, %v789_v43  ;;  %vm794_vm3 = vweird.f32 %v1563_v32 }
  0x57   : > { %1194 = vst [vmem:[%s2168_s6 + $0x8] sm:$0xff] %v741_v49  ;;  %v751_v45 = vsel %vm2162_vm1, %v1557_v6, %v747_v50  ;;  %v777_v57 = vadd.f32 %v1561_v17, %v776_v51  ;;  %v812_v39 = vand.u32 2147483647, %v2149_v31  ;;  %v814_v58 = vand.u32 2147483648, %v2149_v31 }
  0x58   : > { %v756_v46 = vsel %vm2116_vm8, %v2109_v63, %v751_v45  ;;  %v766_v59 = vsel %vm2176_vm2, %v1559_v10, %v762_v53  ;;  %v791_v60 = vmul.f32 %v1563_v32, %v790_v55  ;;  %1566 = vrcp.f32 %v2153_v36 }
  0x59   : > { %1195 = vst [vmem:[%s2168_s6 + $0x10] sm:$0xff] %v756_v46  ;;  %v771_v61 = vsel %vm2121_vm10, %v770_v5, %v766_v59  ;;  %v781_v62 = vsel %vm2185_vm4, %v1561_v17, %v777_v57  ;;  %vm2948_vm5 = vweird.f32 %v2099_v56  ;;  %vm2211_vm7 = vcmp.eq.f32.partialorder %v797_v9, 8.507059e+37  ;;  %v369_v17 = vld [vmem:[%s1984_s29 + $0x70] sm:$0xff] }
  0x5a   : > { %vm2207_vm6 = vmor %vm2948_vm5, %vm794_vm3  ;;  %v800_v1 = vor.u32 1.1754944e-38, %v799_v23  ;;  %1196 = vst [vmem:[%s2168_s6 + $0x18] sm:$0xff] %v771_v61  ;;  %v786_v2 = vsel %vm2128_vm12, %v785_v16, %v781_v62  ;;  %v792_v3 = vadd.f32 %v1563_v32, %v791_v60  ;;  %vm808_vm8 = vweird.f32 %v2149_v31  ;;  %v1565_v7 = vpop.eup %1564 }
  0x5b   : > { %v2219_v4 = vor.u32 1.1754944e-38, %v814_v58  ;;  %1197 = vst [vmem:[%s2168_s6 + $0x20] sm:$0xff] %v786_v2  ;;  %vm2222_vm9 = vcmp.eq.f32.partialorder %v812_v39, 8.507059e+37  ;;  %vm823_vm10 = vweird.f32 %v2153_v36  ;;  %1568 = vpow2.f32 %v1422_v52  ;;  %v466_v52 = vld [vmem:[%s2001_s21 + $0x78] sm:$0xff] }
  0x5c   : > { %v562_v5 = vadd.f32 %v2017_v18, %v2066_v35  ;;  %v563_v6 = vadd.f32 %v2012_v12, %v2085_v47  ;;  %v796_v8 = vsel %vm2207_vm6, %v1563_v32, %v792_v3  ;;  %v827_v9 = vand.u32 2147483647, %v2153_v36  ;;  %v2295_v3 = vld [vmem:[%s1984_s29 + $0x80] sm:$0xff] }
  0x5d   : > { %v526_v10 = vmul.f32 %v2074_v40, %v2049_v11  ;;  %v527_v13 = vmul.f32 %v2087_v48, %v2054_v21  ;;  %v801_v35 = vsel %vm2211_vm7, %v800_v1, %v796_v8  ;;  %v804_v47 = vmul.f32 %v1565_v7, %v2149_v31 }
  0x5e   : > { %vm809_vm11 = vweird.f32 %v1565_v7  ;;  %v829_v16 = vand.u32 2147483648, %v2153_v36  ;;  %v1567_v11 = vpop.eup %1566  ;;  %1198 = vst [vmem:[%s2168_s6 + $0x28] sm:$0xff] %v801_v35  ;;  %v1423_v40 = vmul.f32 -1.442695, %v562_v5  ;;  %v1424_v20 = vmul.f32 -1.442695, %v563_v6 }
  0x5f   : > { %v564_v21 = vadd.f32 %v2017_v18, %v526_v10  ;;  %v565_v48 = vadd.f32 %v2012_v12, %v527_v13  ;;  %v805_v23 = vsub.f32 1.0, %v804_v47  ;;  %v819_v24 = vmul.f32 %v1567_v11, %v2153_v36  ;;  %vm2257_vm13 = vmor %vm808_vm8, %vm809_vm11 }
  0x60   : > { %vm824_vm12 = vweird.f32 %v1567_v11  ;;  %v432_v25 = vmul.f32 %v400_v15, %v368_v14  ;;  %1570 = vpow2.f32 %v1423_v40  ;;  %v433_v33 = vmul.f32 %v401_v19, %v369_v17 }
  0x61   : > { %v1425_v29 = vmul.f32 -1.442695, %v564_v21  ;;  %v1426_v32 = vmul.f32 -1.442695, %v565_v48  ;;  %v1569_v34 = vpop.eup %1568  ;;  %v806_v30 = vmul.f32 %v1565_v7, %v805_v23  ;;  %v820_v37 = vsub.f32 1.0, %v819_v24  ;;  %vm2267_vm14 = vmor %vm823_vm10, %vm824_vm12 }
  0x62   : > { %1572 = vpow2.f32 %v1424_v20  ;;  %v496_v38 = vadd.f32 %v464_v22, %v432_v25  ;;  %v2261_v42 = vadd.f32 1.0, %v1569_v34  ;;  %v497_v43 = vadd.f32 %v465_v26, %v433_v33 }
  0x63   : > { %1574 = vpow2.f32 %v1425_v29  ;;  %v434_v49 = vmul.f32 %v402_v28, %v370_v27  ;;  %v807_v50 = vadd.f32 %v1565_v7, %v806_v30  ;;  %v821_v44 = vmul.f32 %v1567_v11, %v820_v37  ;;  %v467_v37 = vld [vmem:[%s2001_s21 + $0x80] sm:$0xff] }
  0x64   : > { %1576 = vpow2.f32 %v1426_v32  ;;  %v528_v51 = vmul.f32 %v496_v38, %v368_v14  ;;  %vm2271_vm15 = vcmp.eq.f32.partialorder %v827_v9, 8.507059e+37  ;;  %v830_v54 = vor.u32 1.1754944e-38, %v829_v16 }
  0x65   : > { %1578 = vrcp.f32 %v2261_v42  ;;  %v842_v55 = vand.u32 2147483647, %v2261_v42  ;;  %v811_v45 = vsel %vm2257_vm13, %v1565_v7, %v807_v50  ;;  %v822_v57 = vadd.f32 %v1567_v11, %v821_v44 }
  0x66   : > { %v566_v36 = vadd.f32 %v2017_v18, %v528_v51  ;;  %v529_v39 = vmul.f32 %v497_v43, %v369_v17  ;;  %v1571_v58 = vpop.eup %1570  ;;  %v816_v46 = vsel %vm2222_vm9, %v2219_v4, %v811_v45  ;;  %v498_v59 = vadd.f32 %v466_v52, %v434_v49  ;;  %v403_v4 = vld [vmem:[%s1992_s23 + $0x80] sm:$0xff]  ;;  %v404_v45 = vld [vmem:[%s1992_s23 + $0x88] sm:$0xff] }
  0x67   : > { %1199 = vst [vmem:[%s2168_s6 + $0x30] sm:$0xff] %v816_v46  ;;  %v826_v61 = vsel %vm2267_vm14, %v1567_v11, %v822_v57  ;;  %v844_v62 = vand.u32 2147483648, %v2261_v42  ;;  %v2287_v0 = vadd.f32 1.0, %v1571_v58  ;;  %vm838_vm0 = vweird.f32 %v2261_v42 }
  0x68   : > { %v1573_v60 = vpop.eup %1572  ;;  %v831_v1 = vsel %vm2271_vm15, %v830_v54, %v826_v61  ;;  %vm2299_vm1 = vcmp.eq.f32.partialorder %v842_v55, 8.507059e+37  ;;  %v1427_v6 = vmul.f32 -1.442695, %v566_v36  ;;  %v567_v7 = vadd.f32 %v2012_v12, %v529_v39  ;;  %v2354_v55 = vld [vmem:[%s1984_s29 + $0x88] sm:$0xff] }
  0x69   : > { %v1575_v63 = vpop.eup %1574  ;;  %v2292_v2 = vadd.f32 1.0, %v1573_v60  ;;  %1200 = vst [vmem:[%s2168_s6 + $0x38] sm:$0xff] %v831_v1  ;;  %1580 = vrcp.f32 %v2287_v0  ;;  %v857_v9 = vand.u32 2147483647, %v2287_v0  ;;  %v859_v10 = vand.u32 2147483648, %v2287_v0  ;;  %v376_v36 = vld [vmem:[%s1984_s29 + $0xa8] sm:$0xff] }
  0x6a   : > { %v1577_v56 = vpop.eup %1576  ;;  %v530_v13 = vmul.f32 %v498_v59, %v370_v27  ;;  %v845_v15 = vor.u32 1.1754944e-38, %v844_v62  ;;  %vm853_vm2 = vweird.f32 %v2287_v0  ;;  %v435_v35 = vmul.f32 %v403_v4, %v2295_v3 }
  0x6b   : > { %v1579_v8 = vpop.eup %1578  ;;  %1582 = vrcp.f32 %v2292_v2  ;;  %v872_v47 = vand.u32 2147483647, %v2292_v2  ;;  %v874_v16 = vand.u32 2147483648, %v2292_v2  ;;  %v2313_v17 = vadd.f32 1.0, %v1575_v63 }
  0x6c   : > { %v834_v14 = vmul.f32 %v1579_v8, %v2261_v42  ;;  %v2315_v19 = vadd.f32 1.0, %v1577_v56  ;;  %vm839_vm4 = vweird.f32 %v1579_v8  ;;  %vm868_vm3 = vweird.f32 %v2292_v2 }
  0x6d   : > { %1584 = vpow2.f32 %v1427_v6  ;;  %vm2318_vm5 = vcmp.eq.f32.partialorder %v857_v9, 8.507059e+37  ;;  %v860_v20 = vor.u32 1.1754944e-38, %v859_v10  ;;  %v1428_v21 = vmul.f32 -1.442695, %v567_v7  ;;  %vm2329_vm6 = vmor %vm838_vm0, %vm839_vm4  ;;  %v468_v10 = vld [vmem:[%s2001_s21 + $0x88] sm:$0xff] }
  0x6e   : > { %v835_v11 = vsub.f32 1.0, %v834_v14  ;;  %1586 = vrcp.f32 %v2313_v17  ;;  %v568_v48 = vadd.f32 %v2017_v18, %v530_v13  ;;  %v887_v24 = vand.u32 2147483647, %v2313_v17  ;;  %v2390_v13 = vld [vmem:[%s1984_s29 + $0x90] sm:$0xff] }
  0x6f   : > { %v1581_v22 = vpop.eup %1580  ;;  %v889_v25 = vand.u32 2147483648, %v2313_v17  ;;  %1588 = vrcp.f32 %v2315_v19  ;;  %vm2334_vm7 = vcmp.eq.f32.partialorder %v872_v47, 8.507059e+37  ;;  %v875_v32 = vor.u32 1.1754944e-38, %v874_v16  ;;  %v405_v14 = vld [vmem:[%s1992_s23 + $0x90] sm:$0xff] }
  0x70   : > { %v836_v23 = vmul.f32 %v1579_v8, %v835_v11  ;;  %v849_v28 = vmul.f32 %v1581_v22, %v2287_v0  ;;  %vm883_vm8 = vweird.f32 %v2313_v17  ;;  %vm898_vm9 = vweird.f32 %v2315_v19 }
  0x71   : > { %v1583_v26 = vpop.eup %1582  ;;  %v902_v30 = vand.u32 2147483647, %v2315_v19  ;;  %vm854_vm10 = vweird.f32 %v1581_v22  ;;  %1590 = vpow2.f32 %v1428_v21  ;;  %v1429_v41 = vmul.f32 -1.442695, %v568_v48 }
  0x72   : > { %v837_v33 = vadd.f32 %v1579_v8, %v836_v23  ;;  %v864_v34 = vmul.f32 %v1583_v26, %v2292_v2  ;;  %v850_v38 = vsub.f32 1.0, %v849_v28  ;;  %vm869_vm11 = vweird.f32 %v1583_v26  ;;  %vm2361_vm13 = vmor %vm853_vm2, %vm854_vm10 }
  0x73   : > { %v1585_v42 = vpop.eup %1584  ;;  %vm2345_vm12 = vcmp.eq.f32.partialorder %v887_v24, 8.507059e+37  ;;  %v890_v44 = vor.u32 1.1754944e-38, %v889_v25  ;;  %v499_v54 = vadd.f32 %v467_v37, %v435_v35  ;;  %v904_v46 = vand.u32 2147483648, %v2315_v19  ;;  %vm2370_vm14 = vmor %vm868_vm3, %vm869_vm11  ;;  %v406_v37 = vld [vmem:[%s1992_s23 + $0x98] sm:$0xff] }
  0x74   : > { %v841_v43 = vsel %vm2329_vm6, %v1579_v8, %v837_v33  ;;  %v865_v49 = vsub.f32 1.0, %v864_v34  ;;  %v1587_v51 = vpop.eup %1586  ;;  %v851_v31 = vmul.f32 %v1581_v22, %v850_v38  ;;  %v2351_v53 = vadd.f32 1.0, %v1585_v42  ;;  %v469_v34 = vld [vmem:[%s2001_s21 + $0x90] sm:$0xff] }
  0x75   : > { %v846_v52 = vsel %vm2299_vm1, %v845_v15, %v841_v43  ;;  %v1589_v57 = vpop.eup %1588  ;;  %v879_v58 = vmul.f32 %v1587_v51, %v2313_v17  ;;  %1592 = vpow2.f32 %v1429_v41  ;;  %vm2375_vm15 = vcmp.eq.f32.partialorder %v902_v30, 8.507059e+37  ;;  %v374_v30 = vld [vmem:[%s1984_s29 + $0x98] sm:$0xff]  ;;  %v375_v43 = vld [vmem:[%s1984_s29 + $0xa0] sm:$0xff] }
  0x76   : > { %1201 = vst [vmem:[%s2168_s6 + $0x40] sm:$0xff] %v846_v52  ;;  %v866_v39 = vmul.f32 %v1583_v26, %v865_v49  ;;  %v852_v59 = vadd.f32 %v1581_v22, %v851_v31  ;;  %v894_v61 = vmul.f32 %v1589_v57, %v2315_v19  ;;  %1594 = vrcp.f32 %v2351_v53  ;;  %v407_v49 = vld [vmem:[%s1992_s23 + $0xa0] sm:$0xff] }
  0x77   : > { %v880_v63 = vsub.f32 1.0, %v879_v58  ;;  %vm884_vm0 = vweird.f32 %v1587_v51  ;;  %v436_v1 = vmul.f32 %v404_v45, %v2354_v55  ;;  %v1591_v2 = vpop.eup %1590  ;;  %vm899_vm1 = vweird.f32 %v1589_v57  ;;  %v411_v31 = vld [vmem:[%s1992_s23 + $0xc0] sm:$0xff] }
  0x78   : > { %v867_v0 = vadd.f32 %v1583_v26, %v866_v39  ;;  %v856_v4 = vsel %vm2361_vm13, %v1581_v22, %v852_v59  ;;  %v895_v56 = vsub.f32 1.0, %v894_v61  ;;  %v531_v5 = vmul.f32 %v499_v54, %v2295_v3  ;;  %vm2399_vm2 = vmor %vm883_vm8, %vm884_vm0  ;;  %v408_v39 = vld [vmem:[%s1992_s23 + $0xa8] sm:$0xff] }
  0x79   : > { %v861_v6 = vsel %vm2318_vm5, %v860_v20, %v856_v4  ;;  %v881_v8 = vmul.f32 %v1587_v51, %v880_v63  ;;  %v905_v9 = vor.u32 1.1754944e-38, %v904_v46  ;;  %v917_v47 = vand.u32 2147483647, %v2351_v53  ;;  %vm2410_vm4 = vmor %vm898_vm9, %vm899_vm1 }
  0x7a   : > { %v871_v7 = vsel %vm2370_vm14, %v1583_v26, %v867_v0  ;;  %1202 = vst [vmem:[%s2168_s6 + $0x48] sm:$0xff] %v861_v6  ;;  %v896_v35 = vmul.f32 %v1589_v57, %v895_v56  ;;  %v2404_v16 = vadd.f32 1.0, %v1591_v2  ;;  %vm913_vm3 = vweird.f32 %v2351_v53  ;;  %v377_v0 = vld [vmem:[%s1984_s29 + $0xb0] sm:$0xff] }
  0x7b   : > { %v876_v15 = vsel %vm2334_vm7, %v875_v32, %v871_v7  ;;  %v1593_v11 = vpop.eup %1592  ;;  %v882_v40 = vadd.f32 %v1587_v51, %v881_v8  ;;  %v919_v17 = vand.u32 2147483648, %v2351_v53  ;;  %v569_v21 = vadd.f32 %v2012_v12, %v531_v5 }
  0x7c   : > { %1203 = vst [vmem:[%s2168_s6 + $0x50] sm:$0xff] %v876_v15  ;;  %v1595_v48 = vpop.eup %1594  ;;  %v897_v22 = vadd.f32 %v1589_v57, %v896_v35  ;;  %1596 = vrcp.f32 %v2404_v16  ;;  %v500_v23 = vadd.f32 %v468_v10, %v436_v1  ;;  %v437_v19 = vmul.f32 %v405_v14, %v2390_v13 }
  0x7d   : > { %v886_v24 = vsel %vm2399_vm2, %v1587_v51, %v882_v40  ;;  %v909_v25 = vmul.f32 %v1595_v48, %v2351_v53  ;;  %v932_v26 = vand.u32 2147483647, %v2404_v16  ;;  %v934_v27 = vand.u32 2147483648, %v2404_v16  ;;  %v470_v51 = vld [vmem:[%s2001_s21 + $0x98] sm:$0xff] }
  0x7e   : > { %v891_v28 = vsel %vm2345_vm12, %v890_v44, %v886_v24  ;;  %v901_v29 = vsel %vm2410_vm4, %v1589_v57, %v897_v22  ;;  %vm2428_vm5 = vcmp.eq.f32.partialorder %v917_v47, 8.507059e+37  ;;  %v2432_v33 = vadd.f32 1.0, %v1593_v11  ;;  %v471_v57 = vld [vmem:[%s2001_s21 + $0xa0] sm:$0xff]  ;;  %v472_v47 = vld [vmem:[%s2001_s21 + $0xa8] sm:$0xff] }
  0x7f   : > { %1204 = vst [vmem:[%s2168_s6 + $0x58] sm:$0xff] %v891_v28  ;;  %v906_v38 = vsel %vm2375_vm15, %v905_v9, %v901_v29  ;;  %v910_v41 = vsub.f32 1.0, %v909_v25  ;;  %vm914_vm6 = vweird.f32 %v1595_v48  ;;  %v1430_v42 = vmul.f32 -1.442695, %v569_v21 }
  0x80   : > { %1205 = vst [vmem:[%s2168_s6 + $0x60] sm:$0xff] %v906_v38  ;;  %v920_v50 = vor.u32 1.1754944e-38, %v919_v17  ;;  %vm928_vm7 = vweird.f32 %v2404_v16  ;;  %v935_v44 = vor.u32 1.1754944e-38, %v934_v27  ;;  %1598 = vrcp.f32 %v2432_v33  ;;  %vm2458_vm10 = vmor %vm913_vm3, %vm914_vm6  ;;  %v415_v27 = vld [vmem:[%s1992_s23 + $0xe0] sm:$0xff] }
  0x81   : > { %v911_v52 = vmul.f32 %v1595_v48, %v910_v41  ;;  %vm2446_vm8 = vcmp.eq.f32.partialorder %v932_v26, 8.507059e+37  ;;  %vm943_vm9 = vweird.f32 %v2432_v33  ;;  %1600 = vpow2.f32 %v1430_v42 }
  0x82   : > { %v532_v54 = vmul.f32 %v500_v23, %v2354_v55  ;;  %v501_v45 = vadd.f32 %v469_v34, %v437_v19  ;;  %v1597_v58 = vpop.eup %1596  ;;  %v947_v59 = vand.u32 2147483647, %v2432_v33  ;;  %v949_v60 = vand.u32 2147483648, %v2432_v33  ;;  %v409_v55 = vld [vmem:[%s1992_s23 + $0xb0] sm:$0xff] }
  0x83   : > { %v438_v61 = vmul.f32 %v406_v37, %v374_v30  ;;  %v439_v62 = vmul.f32 %v407_v49, %v375_v43  ;;  %v912_v63 = vadd.f32 %v1595_v48, %v911_v52  ;;  %v924_v1 = vmul.f32 %v1597_v58, %v2404_v16  ;;  %v2515_v52 = vld [vmem:[%s1984_s29 + $0xc0] sm:$0xff] }
  0x84   : > { %vm929_vm11 = vweird.f32 %v1597_v58  ;;  %v570_v53 = vadd.f32 %v2017_v18, %v532_v54  ;;  %v533_v2 = vmul.f32 %v501_v45, %v2390_v13  ;;  %v440_v5 = vmul.f32 %v408_v39, %v376_v36  ;;  %v473_v13 = vld [vmem:[%s2001_s21 + $0xb0] sm:$0xff] }
  0x85   : > { %v502_v4 = vadd.f32 %v470_v51, %v438_v61  ;;  %v503_v56 = vadd.f32 %v471_v57, %v439_v62  ;;  %v916_v6 = vsel %vm2458_vm10, %v1595_v48, %v912_v63  ;;  %v925_v7 = vsub.f32 1.0, %v924_v1  ;;  %vm2481_vm13 = vmor %vm928_vm7, %vm929_vm11  ;;  %v410_v51 = vld [vmem:[%s1992_s23 + $0xb8] sm:$0xff] }
  0x86   : > { %v1431_v8 = vmul.f32 -1.442695, %v570_v53  ;;  %v441_v9 = vmul.f32 %v409_v55, %v377_v0  ;;  %v1599_v10 = vpop.eup %1598  ;;  %v921_v14 = vsel %vm2428_vm5, %v920_v50, %v916_v6  ;;  %v571_v15 = vadd.f32 %v2012_v12, %v533_v2  ;;  %v474_v6 = vld [vmem:[%s2001_s21 + $0xb8] sm:$0xff] }
  0x87   : > { %v534_v3 = vmul.f32 %v502_v4, %v374_v30  ;;  %v535_v35 = vmul.f32 %v503_v56, %v375_v43  ;;  %v1601_v11 = vpop.eup %1600  ;;  %1206 = vst [vmem:[%s2168_s6 + $0x68] sm:$0xff] %v921_v14  ;;  %v926_v40 = vmul.f32 %v1597_v58, %v925_v7  ;;  %v939_v20 = vmul.f32 %v1599_v10, %v2432_v33  ;;  %v475_v7 = vld [vmem:[%s2001_s21 + $0xc0] sm:$0xff] }
  0x88   : > { %vm944_vm12 = vweird.f32 %v1599_v10  ;;  %1602 = vpow2.f32 %v1431_v8  ;;  %v2485_v21 = vadd.f32 1.0, %v1601_v11  ;;  %v1432_v48 = vmul.f32 -1.442695, %v571_v15 }
  0x89   : > { %v572_v22 = vadd.f32 %v2017_v18, %v534_v3  ;;  %v573_v23 = vadd.f32 %v2012_v12, %v535_v35  ;;  %v927_v19 = vadd.f32 %v1597_v58, %v926_v40  ;;  %v940_v24 = vsub.f32 1.0, %v939_v20  ;;  %vm2501_vm15 = vmor %vm943_vm9, %vm944_vm12 }
  0x8a   : > { %v504_v25 = vadd.f32 %v472_v47, %v440_v5  ;;  %v505_v26 = vadd.f32 %v473_v13, %v441_v9  ;;  %vm2489_vm14 = vcmp.eq.f32.partialorder %v947_v59, 8.507059e+37  ;;  %v950_v16 = vor.u32 1.1754944e-38, %v949_v60  ;;  %v2531_v59 = vld [vmem:[%s1984_s29 + $0xc8] sm:$0xff] }
  0x8b   : > { %1604 = vrcp.f32 %v2485_v21  ;;  %v931_v28 = vsel %vm2481_vm13, %v1597_v58, %v927_v19  ;;  %v941_v29 = vmul.f32 %v1599_v10, %v940_v24  ;;  %v1433_v32 = vmul.f32 -1.442695, %v572_v22  ;;  %v412_v60 = vld [vmem:[%s1992_s23 + $0xc8] sm:$0xff] }
  0x8c   : > { %1606 = vpow2.f32 %v1432_v48  ;;  %v936_v34 = vsel %vm2446_vm8, %v935_v44, %v931_v28  ;;  %v962_v37 = vand.u32 2147483647, %v2485_v21  ;;  %v964_v38 = vand.u32 2147483648, %v2485_v21  ;;  %v2509_v44 = vld [vmem:[%s1984_s29 + $0xb8] sm:$0xff] }
  0x8d   : > { %v1434_v41 = vmul.f32 -1.442695, %v573_v23  ;;  %1207 = vst [vmem:[%s2168_s6 + $0x70] sm:$0xff] %v936_v34  ;;  %v942_v43 = vadd.f32 %v1599_v10, %v941_v29  ;;  %1608 = vpow2.f32 %v1433_v32  ;;  %v536_v49 = vmul.f32 %v504_v25, %v376_v36 }
  0x8e   : > { %v1603_v42 = vpop.eup %1602  ;;  %v537_v50 = vmul.f32 %v505_v26, %v377_v0  ;;  %vm958_vm0 = vweird.f32 %v2485_v21  ;;  %vm2525_vm1 = vcmp.eq.f32.partialorder %v962_v37, 8.507059e+37  ;;  %v965_v46 = vor.u32 1.1754944e-38, %v964_v38 }
  0x8f   : > { %v2511_v33 = vadd.f32 1.0, %v1603_v42  ;;  %1610 = vpow2.f32 %v1434_v41  ;;  %v946_v54 = vsel %vm2501_vm15, %v1599_v10, %v942_v43  ;;  %v574_v45 = vadd.f32 %v2017_v18, %v536_v49  ;;  %v478_v42 = vld [vmem:[%s2001_s21 + $0xd8] sm:$0xff]  ;;  %v479_v43 = vld [vmem:[%s2001_s21 + $0xe0] sm:$0xff] }
  0x90   : > { %v575_v57 = vadd.f32 %v2012_v12, %v537_v50  ;;  %v951_v39 = vsel %vm2489_vm14, %v950_v16, %v946_v54  ;;  %v442_v55 = vmul.f32 %v410_v51, %v2509_v44  ;;  %v443_v63 = vmul.f32 %v411_v31, %v2515_v52  ;;  %v417_v31 = vld [vmem:[%s1992_s23 + $0xf0] sm:$0xff] }
  0x91   : > { %v1605_v36 = vpop.eup %1604  ;;  %1612 = vrcp.f32 %v2511_v33  ;;  %1208 = vst [vmem:[%s2168_s6 + $0x78] sm:$0xff] %v951_v39  ;;  %v1435_v0 = vmul.f32 -1.442695, %v574_v45  ;;  %v977_v1 = vand.u32 2147483647, %v2511_v33  ;;  %v979_v53 = vand.u32 2147483648, %v2511_v33 }
  0x92   : > { %v1607_v61 = vpop.eup %1606  ;;  %v954_v62 = vmul.f32 %v1605_v36, %v2485_v21  ;;  %v1436_v4 = vmul.f32 -1.442695, %v575_v57  ;;  %vm959_vm2 = vweird.f32 %v1605_v36  ;;  %v2545_v8 = vmul.f32 %v412_v60, %v2531_v59 }
  0x93   : > { %v2540_v2 = vadd.f32 1.0, %v1607_v61  ;;  %v1609_v56 = vpop.eup %1608  ;;  %1614 = vpow2.f32 %v1435_v0  ;;  %vm973_vm4 = vweird.f32 %v2511_v33  ;;  %vm2558_vm3 = vmor %vm958_vm0, %vm959_vm2  ;;  %vm2562_vm5 = vcmp.eq.f32.partialorder %v977_v1, 8.507059e+37  ;;  %v476_v61 = vld [vmem:[%s2001_s21 + $0xc8] sm:$0xff] }
  0x94   : > { %v955_v5 = vsub.f32 1.0, %v954_v62  ;;  %v2551_v3 = vadd.f32 1.0, %v1609_v56  ;;  %v980_v40 = vor.u32 1.1754944e-38, %v979_v53  ;;  %v506_v20 = vadd.f32 %v474_v6, %v442_v55  ;;  %v481_v6 = vld [vmem:[%s2001_s21 + $0xf0] sm:$0xff] }
  0x95   : > { %v1611_v9 = vpop.eup %1610  ;;  %1616 = vrcp.f32 %v2540_v2  ;;  %v992_v10 = vand.u32 2147483647, %v2540_v2  ;;  %v994_v14 = vand.u32 2147483648, %v2540_v2  ;;  %v507_v17 = vadd.f32 %v475_v7, %v443_v63 }
  0x96   : > { %v956_v15 = vmul.f32 %v1605_v36, %v955_v5  ;;  %v2553_v35 = vadd.f32 1.0, %v1611_v9  ;;  %1618 = vpow2.f32 %v1436_v4  ;;  %vm988_vm6 = vweird.f32 %v2540_v2 }
  0x97   : > { %v1613_v47 = vpop.eup %1612  ;;  %1620 = vrcp.f32 %v2551_v3  ;;  %v2569_v23 = vor.u32 1.1754944e-38, %v994_v14  ;;  %v1007_v21 = vand.u32 2147483647, %v2551_v3  ;;  %v1009_v19 = vand.u32 2147483648, %v2551_v3  ;;  %v381_v14 = vld [vmem:[%s1984_s29 + $0xd0] sm:$0xff] }
  0x98   : > { %v957_v48 = vadd.f32 %v1605_v36, %v956_v15  ;;  %v969_v22 = vmul.f32 %v1613_v47, %v2511_v33  ;;  %1622 = vrcp.f32 %v2553_v35  ;;  %vm974_vm7 = vweird.f32 %v1613_v47  ;;  %v413_v15 = vld [vmem:[%s1992_s23 + $0xd0] sm:$0xff] }
  0x99   : > { %v1615_v24 = vpop.eup %1614  ;;  %vm2576_vm8 = vcmp.eq.f32.partialorder %v992_v10, 8.507059e+37  ;;  %v1022_v16 = vand.u32 2147483647, %v2553_v35  ;;  %v1024_v32 = vand.u32 2147483648, %v2553_v35  ;;  %v538_v34 = vmul.f32 %v506_v20, %v2509_v44  ;;  %vm2592_vm11 = vmor %vm973_vm4, %vm974_vm7 }
  0x9a   : > { %v961_v25 = vsel %vm2558_vm3, %v1605_v36, %v957_v48  ;;  %v970_v26 = vsub.f32 1.0, %v969_v22  ;;  %v539_v30 = vmul.f32 %v507_v17, %v2515_v52  ;;  %vm1003_vm9 = vweird.f32 %v2551_v3 }
  0x9b   : > { %v1617_v28 = vpop.eup %1616  ;;  %v966_v29 = vsel %vm2525_vm1, %v965_v46, %v961_v25  ;;  %vm1018_vm10 = vweird.f32 %v2553_v35  ;;  %vm2596_vm13 = vcmp.eq.f32.partialorder %v1007_v21, 8.507059e+37  ;;  %v1010_v49 = vor.u32 1.1754944e-38, %v1009_v19  ;;  %v414_v25 = vld [vmem:[%s1992_s23 + $0xd8] sm:$0xff] }
  0x9c   : > { %v1619_v37 = vpop.eup %1618  ;;  %1209 = vst [vmem:[%s2168_s6 + $0x80] sm:$0xff] %v966_v29  ;;  %v971_v38 = vmul.f32 %v1613_v47, %v970_v26  ;;  %v984_v41 = vmul.f32 %v1617_v28, %v2540_v2  ;;  %vm989_vm12 = vweird.f32 %v1617_v28  ;;  %v2600_v50 = vadd.f32 1.0, %v1615_v24  ;;  %v383_v26 = vld [vmem:[%s1984_s29 + $0xe0] sm:$0xff] }
  0x9d   : > { %v1621_v44 = vpop.eup %1620  ;;  %vm2602_vm14 = vcmp.eq.f32.partialorder %v1022_v16, 8.507059e+37  ;;  %v2606_v33 = vor.u32 1.1754944e-38, %v1024_v32  ;;  %v2608_v54 = vadd.f32 1.0, %v1619_v37  ;;  %v576_v36 = vadd.f32 %v2017_v18, %v538_v34  ;;  %vm2623_vm0 = vmor %vm988_vm6, %vm989_vm12  ;;  %v384_v34 = vld [vmem:[%s1984_s29 + $0xe8] sm:$0xff] }
  0x9e   : > { %v972_v51 = vadd.f32 %v1613_v47, %v971_v38  ;;  %v985_v52 = vsub.f32 1.0, %v984_v41  ;;  %v1623_v45 = vpop.eup %1622  ;;  %v999_v57 = vmul.f32 %v1621_v44, %v2551_v3  ;;  %1624 = vrcp.f32 %v2600_v50 }
  0x9f   : > { %v577_v39 = vadd.f32 %v2012_v12, %v539_v30  ;;  %vm1004_vm15 = vweird.f32 %v1621_v44  ;;  %v1014_v60 = vmul.f32 %v1623_v45, %v2553_v35  ;;  %v1037_v63 = vand.u32 2147483647, %v2600_v50  ;;  %v477_v35 = vld [vmem:[%s2001_s21 + $0xd0] sm:$0xff] }
  0xa0   : > { %v976_v58 = vsel %vm2592_vm11, %v1613_v47, %v972_v51  ;;  %v986_v46 = vmul.f32 %v1617_v28, %v985_v52  ;;  %v1000_v55 = vsub.f32 1.0, %v999_v57  ;;  %v1039_v1 = vand.u32 2147483648, %v2600_v50  ;;  %vm2639_vm3 = vmor %vm1003_vm9, %vm1004_vm15 }
  0xa1   : > { %v981_v62 = vsel %vm2562_vm5, %v980_v40, %v976_v58  ;;  %v1015_v4 = vsub.f32 1.0, %v1014_v60  ;;  %vm1019_vm1 = vweird.f32 %v1623_v45  ;;  %1626 = vrcp.f32 %v2608_v54 }
  0xa2   : > { %1210 = vst [vmem:[%s2168_s6 + $0x88] sm:$0xff] %v981_v62  ;;  %v987_v53 = vadd.f32 %v1617_v28, %v986_v46  ;;  %v1001_v56 = vmul.f32 %v1621_v44, %v1000_v55  ;;  %vm1033_vm2 = vweird.f32 %v2600_v50  ;;  %vm1048_vm4 = vweird.f32 %v2608_v54  ;;  %vm2659_vm6 = vmor %vm1018_vm10, %vm1019_vm1 }
  0xa3   : > { %v508_v2 = vadd.f32 %v476_v61, %v2545_v8  ;;  %v1016_v7 = vmul.f32 %v1623_v45, %v1015_v4  ;;  %vm2643_vm5 = vcmp.eq.f32.partialorder %v1037_v63, 8.507059e+37  ;;  %v2647_v10 = vor.u32 1.1754944e-38, %v1039_v1 }
  0xa4   : > { %v991_v5 = vsel %vm2623_vm0, %v1617_v28, %v987_v53  ;;  %v1437_v8 = vmul.f32 -1.442695, %v576_v36  ;;  %v2651_v47 = vpop.eup %1624  ;;  %v1002_v13 = vadd.f32 %v1621_v44, %v1001_v56  ;;  %v1052_v40 = vand.u32 2147483647, %v2608_v54 }
  0xa5   : > { %v996_v3 = vsel %vm2576_vm8, %v2569_v23, %v991_v5  ;;  %v1438_v20 = vmul.f32 -1.442695, %v577_v39  ;;  %v1017_v17 = vadd.f32 %v1623_v45, %v1016_v7  ;;  %v1029_v48 = vmul.f32 %v2651_v47, %v2600_v50  ;;  %v382_v23 = vld [vmem:[%s1984_s29 + $0xd8] sm:$0xff]  ;;  %v480_v50 = vld [vmem:[%s2001_s21 + $0xe8] sm:$0xff] }
  0xa6   : > { %1211 = vst [vmem:[%s2168_s6 + $0x90] sm:$0xff] %v996_v3  ;;  %vm1034_vm7 = vweird.f32 %v2651_v47  ;;  %v1054_v22 = vand.u32 2147483648, %v2608_v54  ;;  %v1006_v21 = vsel %vm2639_vm3, %v1621_v44, %v1002_v13  ;;  %1628 = vpow2.f32 %v1437_v8 }
  0xa7   : > { %v540_v19 = vmul.f32 %v508_v2, %v2531_v59  ;;  %v445_v24 = vmul.f32 %v413_v15, %v381_v14  ;;  %v1627_v16 = vpop.eup %1626  ;;  %v1011_v28 = vsel %vm2596_vm13, %v1010_v49, %v1006_v21  ;;  %v1021_v29 = vsel %vm2659_vm6, %v1623_v45, %v1017_v17  ;;  %v416_v59 = vld [vmem:[%s1992_s23 + $0xe8] sm:$0xff]  ;;  %v385_v45 = vld [vmem:[%s1984_s29 + $0xf0] sm:$0xff]  ;;  %vm2703_vm9 = vmor %vm1033_vm2, %vm1034_vm7 }
  0xa8   : > { %v1030_v32 = vsub.f32 1.0, %v1029_v48  ;;  %1630 = vpow2.f32 %v1438_v20  ;;  %1212 = vst [vmem:[%s2168_s6 + $0x98] sm:$0xff] %v1011_v28  ;;  %v1026_v30 = vsel %vm2602_vm14, %v2606_v33, %v1021_v29  ;;  %v1044_v37 = vmul.f32 %v1627_v16, %v2608_v54  ;;  %v418_v28 = vld [vmem:[%s1992_s23 + $0xf8] sm:$0xff] }
  0xa9   : > { %vm2688_vm8 = vcmp.eq.f32.partialorder %v1052_v40, 8.507059e+37  ;;  %v578_v41 = vadd.f32 %v2017_v18, %v540_v19  ;;  %1213 = vst [vmem:[%s2168_s6 + $0xa0] sm:$0xff] %v1026_v30  ;;  %v509_v44 = vadd.f32 %v477_v35, %v445_v24  ;;  %v446_v51 = vmul.f32 %v414_v25, %v382_v23 }
  0xaa   : > { %v1031_v49 = vmul.f32 %v2651_v47, %v1030_v32  ;;  %v447_v52 = vmul.f32 %v415_v27, %v383_v26  ;;  %v1045_v57 = vsub.f32 1.0, %v1044_v37  ;;  %vm1049_vm10 = vweird.f32 %v1627_v16 }
  0xab   : > { %v1439_v36 = vmul.f32 -1.442695, %v578_v41  ;;  %v448_v39 = vmul.f32 %v416_v59, %v384_v34  ;;  %v541_v46 = vmul.f32 %v509_v44, %v381_v14  ;;  %v510_v60 = vadd.f32 %v478_v42, %v446_v51  ;;  %vm2715_vm11 = vmor %vm1048_vm4, %vm1049_vm10 }
  0xac   : > { %v1032_v58 = vadd.f32 %v2651_v47, %v1031_v49  ;;  %v511_v61 = vadd.f32 %v479_v43, %v447_v52  ;;  %v1629_v62 = vpop.eup %1628  ;;  %v1046_v0 = vmul.f32 %v1627_v16, %v1045_v57  ;;  %v1055_v55 = vor.u32 1.1754944e-38, %v1054_v22  ;;  %v482_v52 = vld [vmem:[%s2001_s21 + $0xf8] sm:$0xff] }
  0xad   : > { %1632 = vpow2.f32 %v1439_v36  ;;  %v449_v63 = vmul.f32 %v417_v31, %v385_v45  ;;  %v704_v56 = vadd.f32 1.0, %v1629_v62  ;;  %v579_v2 = vadd.f32 %v2012_v12, %v541_v46 }
  0xae   : > { %v1631_v1 = vpop.eup %1630  ;;  %v1036_v53 = vsel %vm2703_vm9, %v2651_v47, %v1032_v58  ;;  %v542_v5 = vmul.f32 %v510_v60, %v382_v23  ;;  %v1047_v8 = vadd.f32 %v1627_v16, %v1046_v0  ;;  %v543_v15 = vmul.f32 %v511_v61, %v383_v26 }
  0xaf   : > { %v1041_v7 = vsel %vm2643_vm5, %v2647_v10, %v1036_v53  ;;  %v705_v14 = vadd.f32 1.0, %v1631_v1  ;;  %1634 = vrcp.f32 %v704_v56  ;;  %v512_v54 = vadd.f32 %v480_v50, %v448_v39 }
  0xb0   : > { %1214 = vst [vmem:[%s2168_s6 + $0xa8] sm:$0xff] %v1041_v7  ;;  %v1051_v47 = vsel %vm2715_vm11, %v1627_v16, %v1047_v8  ;;  %v513_v3 = vadd.f32 %v481_v6, %v449_v63  ;;  %v1440_v40 = vmul.f32 -1.442695, %v579_v2  ;;  %v580_v9 = vadd.f32 %v2017_v18, %v542_v5  ;;  %v386_v16 = vld [vmem:[%s1984_s29 + $0xf8] sm:$0xff] }
  0xb1   : > { %1636 = vrcp.f32 %v705_v14  ;;  %v1056_v13 = vsel %vm2688_vm8, %v1055_v55, %v1051_v47  ;;  %v581_v10 = vadd.f32 %v2012_v12, %v543_v15  ;;  %v1067_v20 = vand.u32 2147483647, %v704_v56 }
  0xb2   : > { %1215 = vst [vmem:[%s2168_s6 + $0xb0] sm:$0xff] %v1056_v13  ;;  %v544_v48 = vmul.f32 %v512_v54, %v384_v34  ;;  %1638 = vpow2.f32 %v1440_v40  ;;  %v1441_v22 = vmul.f32 -1.442695, %v580_v9  ;;  %v545_v23 = vmul.f32 %v513_v3, %v385_v45 }
  0xb3   : > { %v1633_v11 = vpop.eup %1632  ;;  %v1442_v35 = vmul.f32 -1.442695, %v581_v10  ;;  %vm1063_vm12 = vweird.f32 %v704_v56  ;;  %v1069_v19 = vand.u32 2147483648, %v704_v56  ;;  %vm1078_vm13 = vweird.f32 %v705_v14 }
  0xb4   : > { %v2732_v17 = vadd.f32 1.0, %v1633_v11  ;;  %v1082_v26 = vand.u32 2147483647, %v705_v14  ;;  %v582_v27 = vadd.f32 %v2017_v18, %v544_v48  ;;  %vm2738_vm15 = vcmp.eq.f32.partialorder %v1067_v20, 8.507059e+37 }
  0xb5   : > { %v1635_v21 = vpop.eup %1634  ;;  %v1084_v34 = vand.u32 2147483648, %v705_v14  ;;  %v583_v37 = vadd.f32 %v2012_v12, %v545_v23  ;;  %v1070_v38 = vor.u32 1.1754944e-38, %v1069_v19  ;;  %v450_v42 = vmul.f32 %v418_v28, %v386_v16 }
  0xb6   : > { %1640 = vrcp.f32 %v2732_v17  ;;  %v1059_v25 = vmul.f32 %v1635_v21, %v704_v56  ;;  %vm1064_vm14 = vweird.f32 %v1635_v21  ;;  %v1443_v30 = vmul.f32 -1.442695, %v582_v27 }
  0xb7   : > { %v1637_v24 = vpop.eup %1636  ;;  %1642 = vpow2.f32 %v1441_v22  ;;  %vm2743_vm1 = vcmp.eq.f32.partialorder %v1082_v26, 8.507059e+37  ;;  %v1444_v51 = vmul.f32 -1.442695, %v583_v37  ;;  %vm2750_vm2 = vmor %vm1063_vm12, %vm1064_vm14  ;;  %v1085_v33 = vor.u32 1.1754944e-38, %v1084_v34 }
  0xb8   : > { %v1074_v32 = vmul.f32 %v1637_v24, %v705_v14  ;;  %v1060_v59 = vsub.f32 1.0, %v1059_v25  ;;  %1644 = vpow2.f32 %v1442_v35  ;;  %vm1079_vm0 = vweird.f32 %v1637_v24  ;;  %v1639_v43 = vpop.eup %1638 }
  0xb9   : > { %1646 = vpow2.f32 %v1443_v30  ;;  %vm1093_vm4 = vweird.f32 %v2732_v17  ;;  %v707_v57 = vadd.f32 1.0, %v1639_v43  ;;  %vm2757_vm3 = vmor %vm1078_vm13, %vm1079_vm0  ;;  %v1097_v60 = vand.u32 2147483647, %v2732_v17 }
  0xba   : > { %v1075_v41 = vsub.f32 1.0, %v1074_v32  ;;  %v1061_v49 = vmul.f32 %v1635_v21, %v1060_v59  ;;  %1648 = vpow2.f32 %v1444_v51  ;;  %v1099_v62 = vand.u32 2147483648, %v2732_v17 }
  0xbb   : > { %1650 = vrcp.f32 %v707_v57  ;;  %v514_v0 = vadd.f32 %v482_v52, %v450_v42  ;;  %vm1098_vm7 = vcmp.eq.f32.partialorder %v1097_v60, 8.507059e+37  ;;  %v1112_v54 = vand.u32 2147483647, %v707_v57 }
  0xbc   : > { %v1641_v45 = vpop.eup %1640  ;;  %v1076_v12 = vmul.f32 %v1637_v24, %v1075_v41  ;;  %v1062_v39 = vadd.f32 %v1635_v21, %v1061_v49  ;;  %v1100_v8 = vor.u32 1.1754944e-38, %v1099_v62  ;;  %vm1108_vm8 = vweird.f32 %v707_v57 }
  0xbd   : > { %v1643_v36 = vpop.eup %1642  ;;  %v1089_v46 = vmul.f32 %v1641_v45, %v2732_v17  ;;  %vm1094_vm5 = vweird.f32 %v1641_v45  ;;  %v546_v47 = vmul.f32 %v514_v0, %v386_v16  ;;  %v1114_v13 = vand.u32 2147483648, %v707_v57 }
  0xbe   : > { %v1077_v61 = vadd.f32 %v1637_v24, %v1076_v12  ;;  %v1645_v55 = vpop.eup %1644  ;;  %v1066_v50 = vsel %vm2750_vm2, %v1635_v21, %v1062_v39  ;;  %v2766_v1 = vadd.f32 1.0, %v1643_v36  ;;  %vm2781_vm6 = vmor %vm1093_vm4, %vm1094_vm5  ;;  %vm2798_vm10 = vcmp.eq.f32.partialorder %v1112_v54, 8.507059e+37 }
  0xbf   : > { %v1090_v63 = vsub.f32 1.0, %v1089_v46  ;;  %v1071_v53 = vsel %vm2738_vm15, %v1070_v38, %v1066_v50  ;;  %v2772_v56 = vadd.f32 1.0, %v1645_v55  ;;  %v1647_v2 = vpop.eup %1646  ;;  %v1115_v25 = vor.u32 1.1754944e-38, %v1114_v13 }
  0xc0   : > { %v1081_v4 = vsel %vm2757_vm3, %v1637_v24, %v1077_v61  ;;  %1216 = vst [vmem:[%s2168_s6 + $0xb8] sm:$0xff] %v1071_v53  ;;  %1652 = vrcp.f32 %v2766_v1  ;;  %v1649_v14 = vpop.eup %1648  ;;  %v2786_v11 = vadd.f32 1.0, %v1647_v2  ;;  %v1127_v20 = vand.u32 2147483647, %v2766_v1 }
  0xc1   : > { %v1086_v5 = vsel %vm2743_vm1, %v1085_v33, %v1081_v4  ;;  %v1091_v6 = vmul.f32 %v1641_v45, %v1090_v63  ;;  %1654 = vrcp.f32 %v2772_v56  ;;  %v1651_v3 = vpop.eup %1650  ;;  %v2788_v40 = vadd.f32 1.0, %v1649_v14 }
  0xc2   : > { %1217 = vst [vmem:[%s2168_s6 + $0xc0] sm:$0xff] %v1086_v5  ;;  %v1104_v10 = vmul.f32 %v1651_v3, %v707_v57  ;;  %v1129_v17 = vand.u32 2147483648, %v2766_v1  ;;  %v1142_v22 = vand.u32 2147483647, %v2772_v56  ;;  %v1144_v35 = vand.u32 2147483648, %v2772_v56 }
  0xc3   : > { %v1092_v15 = vadd.f32 %v1641_v45, %v1091_v6  ;;  %1656 = vrcp.f32 %v2786_v11  ;;  %vm1109_vm9 = vweird.f32 %v1651_v3  ;;  %vm1123_vm11 = vweird.f32 %v2766_v1 }
  0xc4   : > { %v1105_v21 = vsub.f32 1.0, %v1104_v10  ;;  %1658 = vrcp.f32 %v2788_v40  ;;  %vm1138_vm12 = vweird.f32 %v2772_v56  ;;  %vm2806_vm13 = vcmp.eq.f32.partialorder %v1127_v20, 8.507059e+37  ;;  %vm2812_vm14 = vmor %vm1108_vm8, %vm1109_vm9 }
  0xc5   : > { %v1096_v9 = vsel %vm2781_vm6, %v1641_v45, %v1092_v15  ;;  %v1130_v28 = vor.u32 1.1754944e-38, %v1129_v17  ;;  %vm2816_vm0 = vcmp.eq.f32.partialorder %v1142_v22, 8.507059e+37  ;;  %v1145_v30 = vor.u32 1.1754944e-38, %v1144_v35 }
  0xc6   : > { %v1101_v48 = vsel %vm1098_vm7, %v1100_v8, %v1096_v9  ;;  %v1653_v23 = vpop.eup %1652  ;;  %v1106_v27 = vmul.f32 %v1651_v3, %v1105_v21  ;;  %v584_v41 = vadd.f32 %v2017_v18, %v546_v47  ;;  %vm1153_vm2 = vweird.f32 %v2786_v11 }
  0xc7   : > { %1218 = vst [vmem:[%s2168_s6 + $0xc8] sm:$0xff] %v1101_v48  ;;  %v1655_v24 = vpop.eup %1654  ;;  %v1119_v26 = vmul.f32 %v1653_v23, %v2766_v1  ;;  %vm1124_vm15 = vweird.f32 %v1653_v23  ;;  %v1157_v49 = vand.u32 2147483647, %v2786_v11  ;;  %v1159_v44 = vand.u32 2147483648, %v2786_v11 }
  0xc8   : > { %v1134_v29 = vmul.f32 %v1655_v24, %v2772_v56  ;;  %v1107_v37 = vadd.f32 %v1651_v3, %v1106_v27  ;;  %vm1139_vm1 = vweird.f32 %v1655_v24  ;;  %vm2828_vm4 = vmor %vm1123_vm11, %vm1124_vm15  ;;  %vm1168_vm3 = vweird.f32 %v2788_v40 }
  0xc9   : > { %v1120_v34 = vsub.f32 1.0, %v1119_v26  ;;  %v1657_v42 = vpop.eup %1656  ;;  %vm2839_vm5 = vmor %vm1138_vm12, %vm1139_vm1  ;;  %v1174_v39 = vand.u32 2147483648, %v2788_v40  ;;  %v1445_v60 = vmul.f32 -1.442695, %v584_v41  ;;  %v1172_v0 = vand.u32 2147483647, %v2788_v40 }
  0xca   : > { %v1135_v38 = vsub.f32 1.0, %v1134_v29  ;;  %v1659_v51 = vpop.eup %1658  ;;  %v1111_v52 = vsel %vm2812_vm14, %v1651_v3, %v1107_v37  ;;  %v1149_v31 = vmul.f32 %v1657_v42, %v2786_v11  ;;  %vm1154_vm6 = vweird.f32 %v1657_v42 }
  0xcb   : > { %v1121_v43 = vmul.f32 %v1653_v23, %v1120_v34  ;;  %v1116_v12 = vsel %vm2798_vm10, %v1115_v25, %v1111_v52  ;;  %v1164_v36 = vmul.f32 %v1659_v51, %v2788_v40  ;;  %vm1169_vm7 = vweird.f32 %v1659_v51  ;;  %vm1155_vm8 = vmor %vm1153_vm2, %vm1154_vm6 }
  0xcc   : > { %v1136_v18 = vmul.f32 %v1655_v24, %v1135_v38  ;;  %1219 = vst [vmem:[%s2168_s6 + $0xd0] sm:$0xff] %v1116_v12  ;;  %v1150_v46 = vsub.f32 1.0, %v1149_v31  ;;  %1660 = vpow2.f32 %v1445_v60  ;;  %v1160_v53 = vor.u32 1.1754944e-38, %v1159_v44  ;;  %vm1170_vm10 = vmor %vm1168_vm3, %vm1169_vm7 }
  0xcd   : > { %v1122_v33 = vadd.f32 %v1653_v23, %v1121_v43  ;;  %v1165_v62 = vsub.f32 1.0, %v1164_v36  ;;  %vm1158_vm9 = vcmp.eq.f32.partialorder %v1157_v49, 8.507059e+37  ;;  %v1175_v2 = vor.u32 1.1754944e-38, %v1174_v39 }
  0xce   : > { %v1137_v58 = vadd.f32 %v1655_v24, %v1136_v18  ;;  %v1151_v63 = vmul.f32 %v1657_v42, %v1150_v46  ;;  %vm1173_vm11 = vcmp.eq.f32.partialorder %v1172_v0, 8.507059e+37 }
  0xcf   : > { %v1126_v61 = vsel %vm2828_vm4, %v1653_v23, %v1122_v33  ;;  %v1166_v4 = vmul.f32 %v1659_v51, %v1165_v62 }
  0xd0   : > { %v1131_v55 = vsel %vm2806_vm13, %v1130_v28, %v1126_v61  ;;  %v1141_v50 = vsel %vm2839_vm5, %v1655_v24, %v1137_v58  ;;  %v1152_v56 = vadd.f32 %v1657_v42, %v1151_v63 }
  0xd1   : > { %1220 = vst [vmem:[%s2168_s6 + $0xd8] sm:$0xff] %v1131_v55  ;;  %v1146_v1 = vsel %vm2816_vm0, %v1145_v30, %v1141_v50  ;;  %v1167_v5 = vadd.f32 %v1659_v51, %v1166_v4 }
  0xd2   : > { %1221 = vst [vmem:[%s2168_s6 + $0xe0] sm:$0xff] %v1146_v1  ;;  %v1156_v6 = vsel %vm1155_vm8, %v1657_v42, %v1152_v56  ;;  %v1661_v14 = vpop.eup %1660 }
  0xd3   : > { %v1161_v7 = vsel %vm1158_vm9, %v1160_v53, %v1156_v6  ;;  %v1171_v8 = vsel %vm1170_vm10, %v1659_v51, %v1167_v5  ;;  %v712_v54 = vadd.f32 1.0, %v1661_v14 }
  0xd4   : > { %1222 = vst [vmem:[%s2168_s6 + $0xe8] sm:$0xff] %v1161_v7  ;;  %v1176_v15 = vsel %vm1173_vm11, %v1175_v2, %v1171_v8 }
  0xd5   : > { %1223 = vst [vmem:[%s2168_s6 + $0xf0] sm:$0xff] %v1176_v15  ;;  %1662 = vrcp.f32 %v712_v54  ;;  %v1189_v13 = vand.u32 2147483648, %v712_v54  ;;  %vm1183_vm12 = vweird.f32 %v712_v54  ;;  %v1187_v40 = vand.u32 2147483647, %v712_v54 }
  0xd7   : > { %v1190_v10 = vor.u32 1.1754944e-38, %v1189_v13  ;;  %vm1188_vm15 = vcmp.eq.f32.partialorder %v1187_v40, 8.507059e+37 }
  0xdb   : > { %v1663_v47 = vpop.eup %1662 }
  0xdc   : > { %v1179_v3 = vmul.f32 %v1663_v47, %v712_v54  ;;  %vm1184_vm13 = vweird.f32 %v1663_v47 }
  0xdd   : > { %vm1185_vm14 = vmor %vm1183_vm12, %vm1184_vm13 }
  0xde   : > { %v1180_v11 = vsub.f32 1.0, %v1179_v3 }
  0xe0   : > { %v1181_v9 = vmul.f32 %v1663_v47, %v1180_v11 }
  0xe2   : > { %v1182_v20 = vadd.f32 %v1663_v47, %v1181_v9 }
  0xe4   : > { %v1186_v17 = vsel %vm1185_vm14, %v1663_v47, %v1182_v20 }
  0xe5   : > { %v1191_v48 = vsel %vm1188_vm15, %v1190_v10, %v1186_v17 }
  0xe6   : > { %1224 = vst [vmem:[%s2168_s6 + $0xf8] sm:$0xff] %v1191_v48 }
  0xe7   : > { %1781 = shalt.err (!%p1778_p13)
}
  0xe8   : > { %s1844_s1 = smov 256   ;;  %s1845_s5 = smov 16  }
  0xe9   : > { %1466 = dma.vmem_to_hbm [thread:$0]  (%p1926_p9), %s1242_s25, 4096, %s1244_s10, %s1226_s18, %s1844_s1, %s1844_s1, %s1845_s5  }
  0xea PF: > { %s3044_s17 = sld [smem:[#allocation14_spill]]  ;;  %s1258_s20 = sand.u32 1, %s1820_s15  }
  0xeb   : > { %p1479_p0 = pnand %p1396_p12, %p1933_p11  ;;  %s1259_s23 = scalar_lea.sflag [#allocation4], %s1258_s20 }
  0xed   : > { %p1480_p1 = pneg %p1479_p0 }
  0xef   : > { %1815 = dma.done.wait (%p1480_p1), %s1259_s23, 4096  }
  0xf0   : > { %1817 = vsyncadd (%p1480_p1), %s1259_s23, 4294963200  ;;  %s23_s20 = sadd.s32 1, %s3044_s17   ;;  %s3045_s21 = sld [smem:[#allocation12_spill]] }
  0xf1   : > { %p20_p2 = scmp.ge.s32.totalorder %s23_s20, 4   ;;  %s3046_s17 = sld [smem:[#allocation16_spill]] }
  0xf2   : > { %s3047_s18 = sld [smem:[#allocation13_spill]]  ;;  %s3049_s15 = smov %s1824_s16 }
  0xf3   : > { %s3048_s19 = sld [smem:[#allocation15_spill]]  ;;  %22 = sbr.rel (!%p20_p2) target bundleno = 10 (0xa), region = 108 }
  0xf6   : > { %s3050_s16 = smov %s3045_s21 }
  0xf8   :  { %1265 = vsyncpa [#allocation3], 1 }
  0xf9   :  { %1267 = vsyncpa [#allocation3 + $0x1], 1 }
  0xfa   :  { %1268 = vsyncpa [#allocation6], 1 }
  0xfb   :  { %1270 = vsyncpa [#allocation6 + $0x1], 1 }
  0xfc   :  { %1271 = vsyncpa [#allocation4], 1 }
  0xfd   :  { %1273 = vsyncpa [#allocation4 + $0x1], 1 }

</bundles_post_ra>
